<compile_context>
chip_gen: v7x
topology: tpu7x:2x2x1
jax: 0.10.0
libtpu: 0.0.40
codegen_flags: <defaults>
</compile_context>

<pallas_src>
import jax
import jax.numpy as jnp
from jax.experimental import pallas as pl
from jax.experimental.pallas import tpu as pltpu


def _copy_kernel(x_ref, o_ref):
    # Pure copy: the reshape happened (for free) in the wrapper, so this is
    # just vld/vst on dense, lane-aligned tiles.
    o_ref[...] = x_ref[...]


_TILE_BYTES = 4 * 1024 * 1024      # ~4 MiB blocks -> ~16 MiB pipelined footprint
_VMEM_LIMIT = 48 * 1024 * 1024     # safe on v5e/v6e (128 MiB) and v7x (64 MiB phys)
_MAX_LANES = 8192                  # cap on slab / block lane width


def _aligned_tile(dim, unit, cap):
    """A block extent that is either the full dim (when dim <= unit) or a
    multiple of `unit` capped at `cap`.  Never falls back to a huge full-dim
    block for large unaligned dims: the cdiv grid masks the tail instead."""
    if dim <= unit:
        return dim
    return max(unit, (min(dim, cap) // unit) * unit)


def _pick_slab_width(total):
    """Largest multiple of 128 (<= _MAX_LANES) that evenly divides `total`."""
    best = 0
    cand = 128
    top = min(total, _MAX_LANES)
    while cand <= top:
        if total % cand == 0:
            best = cand
        cand += 128
    return best


def _copy_2d(x2):
    rows, cols = x2.shape
    itemsize = jnp.dtype(x2.dtype).itemsize
    pack = max(1, 4 // itemsize) * 8   # sublanes/vreg: 8 f32 / 16 bf16 / 32 int8

    # Lanes first: widest block the budget allows -> long contiguous DMA bursts.
    td = _aligned_tile(cols, 128, _MAX_LANES)
    row_budget = max(1, _TILE_BYTES // (td * itemsize))
    tb = _aligned_tile(rows, pack, row_budget)

    grid = (pl.cdiv(rows, tb), pl.cdiv(cols, td))
    return pl.pallas_call(
        _copy_kernel,
        out_shape=jax.ShapeDtypeStruct((rows, cols), x2.dtype),
        grid=grid,
        in_specs=[pl.BlockSpec((tb, td), lambda i, j: (i, j))],
        out_specs=pl.BlockSpec((tb, td), lambda i, j: (i, j)),
        input_output_aliases={0: 0},
        compiler_params=pltpu.CompilerParams(
            dimension_semantics=("parallel", "parallel"),
            vmem_limit_bytes=_VMEM_LIMIT,
        ),
    )(x2)


def flatten_layer(x):
    """Pallas implementation of FlatternLayer.forward: x.view(N, -1)."""
    n = x.shape[0]
    d = 1
    for s in x.shape[1:]:
        d *= s
    total = n * d

    # NOTE: the flatten is a free metadata reshape; callers that can accept a
    # view should just use `x.reshape(n, d)` and skip the copy entirely.
    if total == 0:
        return x.reshape(n, d)

    L = _pick_slab_width(total)
    if L:
        # Contiguous lane-dense slab: full 128-lane unmasked stores and full
        # sublane vregs regardless of how n and d are aligned.
        slab = x.reshape(total // L, L)          # free reshape
        out = _copy_2d(slab)
        return out.reshape(n, d)                 # free reshape

    # Fallback (total not a multiple of 128): copy the logical (n, d) view
    # with fixed 8/128-aligned blocks; masked tail keeps VMEM bounded.
    return _copy_2d(x.reshape(n, d))


if __name__ == "__main__":
    key = jax.random.PRNGKey(0)
    # Small NCHW input consistent with the module's forward.
    x = jax.random.normal(key, (2, 4, 16, 16), dtype=jnp.float32)

    # Reference: plain JAX C-order reshape (== torch.view semantics).
    ref = x.reshape(x.shape[0], -1)

    out = flatten_layer(x)
    out = jax.block_until_ready(out)

    assert out.shape == (2, 4 * 16 * 16), out.shape
    assert out.dtype == x.dtype
    assert jnp.array_equal(out, ref)

    print("KERNEL_OK")
</pallas_src>

<mosaic_0001>
module attributes {stable_mosaic.version = 11 : i64} {
  func.func @_copy_kernel(%arg0: i32, %arg1: i32, %arg2: memref<1x2048xf32, #tpu.memory_space<vmem>>, %arg3: memref<1x2048xf32, #tpu.memory_space<vmem>>) attributes {dimension_semantics = [#tpu.dimension_semantics<parallel>, #tpu.dimension_semantics<parallel>], iteration_bounds = array<i64: 1, 1>, scalar_prefetch = 0 : i64, scratch_operands = 0 : i64, tpu.core_type = #tpu.core_type<tc>, window_params = [{transform_indices = @transform_0, window_bounds = array<i64: 1, 2048>}, {transform_indices = @transform_1, window_bounds = array<i64: 1, 2048>}]} {
    %c0 = arith.constant 0 : index
    %c0_0 = arith.constant 0 : index
    %0 = vector.load %arg2[%c0, %c0_0] : memref<1x2048xf32, #tpu.memory_space<vmem>>, vector<1x2048xf32>
    %c0_1 = arith.constant 0 : index
    %c0_2 = arith.constant 0 : index
    %1 = vector.load %arg3[%c0_1, %c0_2] : memref<1x2048xf32, #tpu.memory_space<vmem>>, vector<1x2048xf32>
    tpu.vector_store %arg3[%c0_1, %c0_2], %0 {strides = array<i32>} : memref<1x2048xf32, #tpu.memory_space<vmem>>, vector<1x2048xf32>,
    return
  }
  func.func @transform_0(%arg0: i32, %arg1: i32) -> (i32, i32) {
    %c0_i32 = arith.constant 0 : i32
    return %arg0, %arg1 : i32, i32
  }
  func.func @transform_1(%arg0: i32, %arg1: i32) -> (i32, i32) {
    %c0_i32 = arith.constant 0 : i32
    return %arg0, %arg1 : i32, i32
  }
}

</mosaic_0001>

<bundles_post_ra>
// kernel: tpu_custom_call.1
= control target key start
LH: loop header
LB: loop body
LE: loop exit
PB: predicated region body
PF: predicated region fallthrough
CT: control target
= control target key end

     0   :  { %6 = vsyncpa [#allocation3], 0  ;;  %s126_s0 = inlined_call_operand.hbm [shape: f32[1,2048], index: 0, kind: input, shape index: {}, may-alias: {0,1}]   ;;  %s127_s1 = inlined_call_operand.hbm [shape: f32[1,2048], index: 1, kind: output, shape index: {}, may-alias: {0,1}]  }
   0x1   :  { %7 = vsyncpa [#allocation4], 0  ;;  %s90_s6 = smov [#allocation2]   ;;  %s42_s10 = scalar_lea.hbm %s126_s0, 256 }
   0x2   :  { %s14_s7 = sshll.u32 %s90_s6, 4  ;;  %p43_p0 = scmp.ne.s32.totalorder %s126_s0, %s42_s10  ;;  %s15_s7 = int_to_ptr.vmem [resolvable:$true] %s14_s7 }
   0x3   :  { %p46_p1 = scmp.lt.u32.totalorder %s42_s10, %s126_s0 }
   0x5   :  { %p48_p2 = pnand %p46_p1, %p43_p0 }
   0x7   :  { %51 = shalt.err (!%p48_p2)
}
   0x8   :  { %s52_s15 = scalar_lea.vmem %s15_s7, 256  ;;  %p57_p4 = scmp.lt.s32.totalorder %s15_s7, %s15_s7 }
   0x9   :  { %p53_p3 = scmp.ne.s32.totalorder %s15_s7, %s52_s15  ;;  %p58_p5 = scmp.lt.s32.totalorder %s52_s15, %s52_s15 }
   0xb   :  { %p59_p6 = por %p58_p5, %p57_p4 }
   0xd   :  { %p60_p7 = pnand %p59_p6, %p53_p3 }
   0xf   :  { %63 = shalt.err (!%p60_p7)
}
  0x10   :  { %17 = dma.hbm_to_vmem [thread:$0]  %s126_s0, 256, %s15_s7, [#allocation3]  }
  0x11   :  { %86 = dma.done.wait [#allocation3], 256  }
  0x12   :  { %87 = vsyncadd [#allocation3], 4294967040  ;;  %s91_s18 = smov [#allocation5]   ;;  %v21_v0 = vld [vmem:[#allocation2] sm:$0xff]  ;;  %v22_v1 = vld [vmem:[#allocation2 + $0x8] sm:$0xff] }
  0x13   :  { %s31_s19 = sshll.u32 %s91_s18, 4  ;;  %23 = vst [vmem:[#allocation5] sm:$0xff] %v21_v0  ;;  %24 = vst [vmem:[#allocation5 + $0x8] sm:$0xff] %v22_v1  ;;  %s32_s19 = int_to_ptr.vmem [resolvable:$true] %s31_s19 }
  0x14   :  { %s64_s20 = scalar_lea.vmem %s32_s19, 256  ;;  %p69_p9 = scmp.lt.s32.totalorder %s32_s19, %s32_s19 }
  0x15   :  { %p65_p8 = scmp.ne.s32.totalorder %s32_s19, %s64_s20  ;;  %p70_p10 = scmp.lt.s32.totalorder %s64_s20, %s64_s20 }
  0x17   :  { %p71_p11 = por %p70_p10, %p69_p9 }
  0x19   :  { %p72_p12 = pnand %p71_p11, %p65_p8 }
  0x1b   :  { %75 = shalt.err (!%p72_p12)
}
  0x1c   :  { %s76_s0 = scalar_lea.hbm %s127_s1, 256 }
  0x1d   :  { %p77_p13 = scmp.ne.s32.totalorder %s127_s1, %s76_s0  ;;  %p80_p0 = scmp.lt.u32.totalorder %s76_s0, %s127_s1 }
  0x1f   :  { %p82_p1 = pnand %p80_p0, %p77_p13 }
  0x21   :  { %85 = shalt.err (!%p82_p1)
}
  0x22   :  { %34 = dma.vmem_to_hbm [thread:$0]  %s32_s19, 256, %s127_s1, [#allocation4]  }
  0x23   :  { %88 = dma.done.wait [#allocation4], 256  }
  0x24   :  { %89 = vsyncadd [#allocation4], 4294967040 }
  0x25   :  { %38 = vsyncpa [#allocation3], 1 }
  0x26   :  { %39 = vsyncpa [#allocation4], 1 }

</bundles_post_ra>
